<compile_context>
chip_gen: v7x
topology: tpu7x:2x2x1
jax: 0.10.0
libtpu: 0.0.40
codegen_flags: <defaults>
</compile_context>

<pallas_src>
import jax
import jax.numpy as jnp
from jax.experimental import pallas as pl
from jax.experimental.pallas import tpu as pltpu


_EPS = 1e-08
_EPS_SQ = _EPS * _EPS
_VMEM_LIMIT_BYTES = 32 * 1024 * 1024   # explicit scoped-VMEM limit (safe on v5e/v6e/v7x)
_VMEM_TILE_BUDGET = 20 * 1024 * 1024   # what the tiles may consume, with headroom


def _cosine_sim_kernel(x_ref, w_ref, o_ref, inv_xn_ref):
    """One (tn, tl) tile of cos_sim = x_norm @ w_norm.T.

    W arrives already row-normalized (hoisted to the wrapper).  1/||x_row||
    is computed once per activation tile (inner label-axis index 0), cached
    in VMEM scratch, and reused for every label tile of the same x tile.
    """
    j = pl.program_id(1)          # label-tile index (inner, "arbitrary" axis)

    @pl.when(j == 0)
    def _():
        xf = x_ref[...].astype(jnp.float32)
        ss = jnp.sum(xf * xf, axis=1, keepdims=True)           # (tn, 1)
        # 1/max(||x||, eps) == rsqrt(max(||x||^2, eps^2)) since ||x|| >= 0.
        inv_xn_ref[...] = jax.lax.rsqrt(jnp.maximum(ss, _EPS_SQ))

    # Contract H on both operands -> x @ w.T without materializing w.T
    # (no XLU transpose / VMEM relayout of the W tile).  f32 accumulation.
    s = jax.lax.dot_general(
        x_ref[...], w_ref[...],
        dimension_numbers=(((1,), (1,)), ((), ())),
        preferred_element_type=jnp.float32,
    )                                                           # (tn, tl) f32
    # Row-scale output by cached 1/||x|| (tn*tl multiplies, cheaper than
    # pre-normalizing the whole (tn, H) activation tile).
    o_ref[...] = (s * inv_xn_ref[...]).astype(o_ref.dtype)


def _round_up(v, m):
    return ((v + m - 1) // m) * m


def _vmem_bytes(tn, tl, H, in_isize):
    # double-buffered x & W tiles + double-buffered (f32-sized) output tile
    # + the (tn, 1) scratch (lane-padded to 128).
    return (2 * tn * H + 2 * tl * H) * in_isize + 2 * tn * tl * 4 + tn * 128 * 4


def _select_tiles(n_pad, l_pad, H, in_isize, budget):
    tn_cands = []
    if n_pad <= 1024:
        tn_cands.append(n_pad)                   # single-block fast path on N
    tn_cands += [c for c in (1024, 512, 256, 128, 64, 32, 16, 8)
                 if c <= n_pad and c not in tn_cands]
    # Prefer a VMEM-resident label matrix (tl == l_pad -> W is DMA'd once),
    # then progressively narrower 128-aligned label tiles; within a label
    # tile choice, the largest activation tile that fits the budget.
    tl_cands = [l_pad] + [c for c in (1024, 512, 256, 128) if c < l_pad]
    for tl in tl_cands:
        for tn in tn_cands:
            if _vmem_bytes(tn, tl, H, in_isize) <= budget:
                return tn, tl
    return 8, 128                                # minimal fallback (huge H)


def bert_label_embedding_forward(inputs, label_attention_matrix, *,
                                 vmem_tile_budget_bytes=_VMEM_TILE_BUDGET):
    """inputs: (N, H); label_attention_matrix: (L, H) -> (N, L) cosine sims."""
    N, H = inputs.shape
    L, H2 = label_attention_matrix.shape
    assert H == H2, "hidden size mismatch"

    # Stream bf16 straight through (halves HBM read traffic); everything
    # else goes through f32.  The matmul always accumulates in f32.
    if (inputs.dtype == jnp.bfloat16
            and label_attention_matrix.dtype == jnp.bfloat16):
        stream_dtype = jnp.bfloat16
    else:
        stream_dtype = jnp.float32
    out_dtype = inputs.dtype if inputs.dtype in (jnp.float32, jnp.bfloat16) \
        else jnp.float32
    in_isize = jnp.dtype(stream_dtype).itemsize

    x = inputs.astype(stream_dtype)

    # Hoist W row-normalization out of the kernel: it depends only on W, so
    # do it once here (fused by XLA with the cast/pad) instead of once per
    # grid step.  max(n, eps) == where(n < eps, eps, n) because n >= 0.
    w32 = label_attention_matrix.astype(jnp.float32)
    w_ss = jnp.sum(w32 * w32, axis=1, keepdims=True)
    w = (w32 * jax.lax.rsqrt(jnp.maximum(w_ss, _EPS_SQ))).astype(stream_dtype)

    # Sublane-align N (x8); lane-dense output via a 128-aligned label axis.
    # Zero-padded rows contribute exactly 0 and are sliced off below.
    n_pad = _round_up(max(N, 8), 8)
    l_pad = _round_up(max(L, 1), 128)

    tn, tl = _select_tiles(n_pad, l_pad, H, in_isize, vmem_tile_budget_bytes)
    n_pad = _round_up(n_pad, tn)
    l_pad = _round_up(l_pad, tl)

    if n_pad != N:
        x = jnp.pad(x, ((0, n_pad - N), (0, 0)))
    if l_pad != L:
        w = jnp.pad(w, ((0, l_pad - L), (0, 0)))

    grid = (n_pad // tn, l_pad // tl)

    out = pl.pallas_call(
        _cosine_sim_kernel,
        out_shape=jax.ShapeDtypeStruct((n_pad, l_pad), out_dtype),
        grid_spec=pltpu.PrefetchScalarGridSpec(
            num_scalar_prefetch=0,
            grid=grid,
            in_specs=[
                pl.BlockSpec((tn, H), lambda i, j: (i, 0)),   # activations
                pl.BlockSpec((tl, H), lambda i, j: (j, 0)),   # normalized W
            ],
            out_specs=pl.BlockSpec((tn, tl), lambda i, j: (i, j)),
            scratch_shapes=[pltpu.VMEM((tn, 1), jnp.float32)],
        ),
        compiler_params=pltpu.CompilerParams(
            # N tiles are independent -> megacore-shardable.  The label axis
            # is the inner loop and must run in order so the 1/||x|| cache
            # written at j == 0 is valid for all j > 0 -> "arbitrary".
            dimension_semantics=("parallel", "arbitrary"),
            vmem_limit_bytes=_VMEM_LIMIT_BYTES,
        ),
    )(x, w)

    if n_pad != N or l_pad != L:
        out = out[:N, :L]
    return out


def _reference(inputs, w):
    # Pure-JAX reference mirroring the torch forward, f32-accurate matmul.
    xf = inputs.astype(jnp.float32)
    wf = w.astype(jnp.float32)
    xn = jnp.linalg.norm(xf, axis=1, keepdims=True)
    wn = jnp.linalg.norm(wf, axis=1, keepdims=True)
    x_norm = xf / jnp.where(xn < _EPS, _EPS, xn)
    w_norm = wf / jnp.where(wn < _EPS, _EPS, wn)
    return jnp.matmul(x_norm, w_norm.T, precision=jax.lax.Precision.HIGHEST)


if __name__ == "__main__":
    # TODO(synk): init_weights (filling label_attention_matrix from a
    # pretrained BERT's pooled label-sentence embeddings) is weight init, not
    # forward compute; the matrix is synthesized randomly here.

    # Small shapes consistent with the module's forward:
    #   batch N = 8, hidden_size H = 32, num_labels L = 4
    N, H, L = 8, 32, 4
    key = jax.random.PRNGKey(0)
    k_x, k_w, k_x2, k_w2 = jax.random.split(key, 4)

    inputs = jax.random.normal(k_x, (N, H), dtype=jnp.float32)
    label_attention_matrix = jax.random.normal(k_w, (L, H), dtype=jnp.float32)

    cos_sim = jax.block_until_ready(
        bert_label_embedding_forward(inputs, label_attention_matrix))
    assert cos_sim.shape == (N, L)
    ref = _reference(inputs, label_attention_matrix)
    assert jnp.allclose(cos_sim, ref, atol=1e-5, rtol=1e-5)

    # Larger check: VMEM-resident W, single-block fast path.
    N2, H2, L2 = 384, 256, 200
    x2 = jax.random.normal(k_x2, (N2, H2), dtype=jnp.float32)
    w2 = jax.random.normal(k_w2, (L2, H2), dtype=jnp.float32)
    ref2 = _reference(x2, w2)
    cos2 = jax.block_until_ready(bert_label_embedding_forward(x2, w2))
    assert cos2.shape == (N2, L2)
    assert jnp.allclose(cos2, ref2, atol=1e-4, rtol=1e-4)

    # Force the 2-D streamed-W path (multiple N and L tiles, cached 1/||x||)
    # by shrinking the tile budget; numerics must be unchanged.
    cos3 = jax.block_until_ready(
        bert_label_embedding_forward(x2, w2,
                                     vmem_tile_budget_bytes=512 * 1024))
    assert cos3.shape == (N2, L2)
    assert jnp.allclose(cos3, ref2, atol=1e-4, rtol=1e-4)

    print("KERNEL_OK")
</pallas_src>

<mosaic_0001>
module attributes {stable_mosaic.version = 11 : i64} {
  func.func @_cosine_sim_kernel(%arg0: i32, %arg1: i32, %arg2: memref<8x32xf32, #tpu.memory_space<vmem>>, %arg3: memref<128x32xf32, #tpu.memory_space<vmem>>, %arg4: memref<8x128xf32, #tpu.memory_space<vmem>>, %arg5: memref<8x1xf32, #tpu.memory_space<vmem>>) attributes {dimension_semantics = [#tpu.dimension_semantics<parallel>, #tpu.dimension_semantics<arbitrary>], iteration_bounds = array<i64: 1, 1>, scalar_prefetch = 0 : i64, scratch_operands = 1 : i64, tpu.core_type = #tpu.core_type<tc>, window_params = [{transform_indices = @transform_0, window_bounds = array<i64: 8, 32>}, {transform_indices = @transform_1, window_bounds = array<i64: 128, 32>}, {transform_indices = @transform_2, window_bounds = array<i64: 8, 128>}]} {
    %c0_i32 = arith.constant 0 : i32
    %0 = arith.cmpi eq, %arg1, %c0_i32 : i32
    %1 = arith.extui %0 : i1 to i32
    %c0_i32_0 = arith.constant 0 : i32
    %2 = arith.cmpi ne, %1, %c0_i32_0 : i32
    scf.if %2 {
      %c0_8 = arith.constant 0 : index
      %c0_9 = arith.constant 0 : index
      %10 = vector.load %arg2[%c0_8, %c0_9] : memref<8x32xf32, #tpu.memory_space<vmem>>, vector<8x32xf32>
      %11 = arith.mulf %10, %10 : vector<8x32xf32>
      %cst_10 = arith.constant dense<0.000000e+00> : vector<8xf32>
      %12 = vector.multi_reduction <add>, %11, %cst_10 [1] : vector<8x32xf32> to vector<8xf32>
      %13 = vector.shape_cast %12 : vector<8xf32> to vector<8x1xf32>
      %cst_11 = arith.constant 1.000000e-16 : f32
      %14 = vector.broadcast %cst_11 : f32 to vector<8x1xf32>
      %15 = arith.maximumf %13, %14 : vector<8x1xf32>
      %16 = math.rsqrt %15 : vector<8x1xf32>
      %c0_12 = arith.constant 0 : index
      %c0_13 = arith.constant 0 : index
      %17 = vector.load %arg5[%c0_12, %c0_13] : memref<8x1xf32, #tpu.memory_space<vmem>>, vector<8x1xf32>
      tpu.vector_store %arg5[%c0_12, %c0_13], %16 {strides = array<i32>} : memref<8x1xf32, #tpu.memory_space<vmem>>, vector<8x1xf32>,
    } else {
    }
    %c0 = arith.constant 0 : index
    %c0_1 = arith.constant 0 : index
    %3 = vector.load %arg2[%c0, %c0_1] : memref<8x32xf32, #tpu.memory_space<vmem>>, vector<8x32xf32>
    %c0_2 = arith.constant 0 : index
    %c0_3 = arith.constant 0 : index
    %4 = vector.load %arg3[%c0_2, %c0_3] : memref<128x32xf32, #tpu.memory_space<vmem>>, vector<128x32xf32>
    %cst = arith.constant dense<0.000000e+00> : vector<8x128xf32>
    %5 = tpu.matmul %3, %4, %cst {dimension_numbers = #tpu.dot_dimension_numbers<[1], [1], [0], [0], [0, 0, 1, 0], [], []>} : vector<8x32xf32>, vector<128x32xf32>, vector<8x128xf32> -> vector<8x128xf32>
    %c0_4 = arith.constant 0 : index
    %c0_5 = arith.constant 0 : index
    %6 = vector.load %arg5[%c0_4, %c0_5] : memref<8x1xf32, #tpu.memory_space<vmem>>, vector<8x1xf32>
    %7 = vector.broadcast %6 : vector<8x1xf32> to vector<8x128xf32>
    %8 = arith.mulf %5, %7 : vector<8x128xf32>
    %c0_6 = arith.constant 0 : index
    %c0_7 = arith.constant 0 : index
    %9 = vector.load %arg4[%c0_6, %c0_7] : memref<8x128xf32, #tpu.memory_space<vmem>>, vector<8x128xf32>
    tpu.vector_store %arg4[%c0_6, %c0_7], %8 {strides = array<i32>} : memref<8x128xf32, #tpu.memory_space<vmem>>, vector<8x128xf32>,
    return
  }
  func.func @transform_0(%arg0: i32, %arg1: i32) -> (i32, i32) {
    %c0_i32 = arith.constant 0 : i32
    %c0_i32_0 = arith.constant 0 : i32
    return %arg0, %c0_i32 : i32, i32
  }
  func.func @transform_1(%arg0: i32, %arg1: i32) -> (i32, i32) {
    %c0_i32 = arith.constant 0 : i32
    %c0_i32_0 = arith.constant 0 : i32
    return %arg1, %c0_i32 : i32, i32
  }
  func.func @transform_2(%arg0: i32, %arg1: i32) -> (i32, i32) {
    %c0_i32 = arith.constant 0 : i32
    return %arg0, %arg1 : i32, i32
  }
}

</mosaic_0001>

<bundles_post_ra>
// kernel: tpu_custom_call.1
= control target key start
LH: loop header
LB: loop body
LE: loop exit
PB: predicated region body
PF: predicated region fallthrough
CT: control target
= control target key end

     0   :  { %vm18_vm0 = vcmask 261120   ;;  %v320_v5 = vmov 0.0|0.0   ;;  %vm321_vm2 = vmmov 0   ;;  %v322_v7 = vmov 0.0   ;;  %s427_s0 = inlined_call_operand.vmem [shape: f32[8,32], index: 0, kind: input, shape index: {}]   ;;  %s428_s1 = inlined_call_operand.vmem [shape: f32[128,32], index: 1, kind: input, shape index: {}]   ;;  %s429_s2 = inlined_call_operand.hbm [shape: f32[8,128], index: 2, kind: output, shape index: {}]  }
   0x1   :  { %v16_v0 = vld [vmem:[%s427_s0] sm:$0xff]  ;;  %v28_v2 = vld [vmem:[%s428_s1 + $0x8] sm:$0xff]  ;;  %vm351_vm1 = vmpackc.low %vm18_vm0, %vm18_vm0  ;;  %256 = vmatprep.subr.bf16.mxu0 %v320_v5  ;;  %253 = vmatprep.mubr.msk.f32.mxu0 %vm321_vm2, %v322_v7 }
   0x2   :  { %v27_v1 = vld [vmem:[%s428_s1] sm:$0xff]  ;;  %v17_v3 = vmul.f32 %v16_v0, %v16_v0  ;;  %v29_v9 = vld [vmem:[%s428_s1 + $0x10] sm:$0xff]  ;;  %v30_v10 = vld [vmem:[%s428_s1 + $0x18] sm:$0xff] }
   0x3   :  { %v257_v6 = vpack.c.bf16 %v28_v2, %v27_v1 }
   0x4   :  { %v19_v8 = vsel %vm18_vm0, %v17_v3, 0.0 }
   0x5   :  { %259 = vmatpush3.bf16.xpose.msk.msra.mxu0 %vm351_vm1, %v257_v6  ;;  %20 = vadd.xlane.f32.xlu0 %v19_v8 }
   0x6   :  { %260 = vmatprep.subr.bf16.mxu0 %v320_v5 }
   0x7   :  { %7 = vsyncpa [#allocation4], 0  ;;  %v261_v11 = vpack.c.bf16 %v30_v10, %v29_v9  ;;  %v31_v12 = vld [vmem:[%s428_s1 + $0x20] sm:$0xff]  ;;  %v32_v13 = vld [vmem:[%s428_s1 + $0x28] sm:$0xff]  ;;  %v323_v21 = vmov 0   ;;  %vm24_vm3 = vcmask 7168  }
   0x8   :  { %v265_v14 = vpack.c.bf16 %v32_v13, %v31_v12  ;;  %v33_v15 = vld [vmem:[%s428_s1 + $0x30] sm:$0xff]  ;;  %v34_v16 = vld [vmem:[%s428_s1 + $0x38] sm:$0xff]  ;;  %v35_v18 = vld [vmem:[%s428_s1 + $0x40] sm:$0xff]  ;;  %293 = vset.pattern.permute.xlu0 %v323_v21  ;;  %s324_s14 = smov [#allocation3]  }
   0x9   :  { %v269_v17 = vpack.c.bf16 %v34_v16, %v33_v15  ;;  %v36_v19 = vld [vmem:[%s428_s1 + $0x48] sm:$0xff]  ;;  %v37_v22 = vld [vmem:[%s428_s1 + $0x50] sm:$0xff]  ;;  %v38_v23 = vld [vmem:[%s428_s1 + $0x58] sm:$0xff]  ;;  %s179_s0 = sshll.u32 %s324_s14, 4  ;;  %s180_s0 = int_to_ptr.vmem [resolvable:$true] %s179_s0 }
   0xa   :  { %v273_v20 = vpack.c.bf16 %v36_v19, %v35_v18  ;;  %v277_v24 = vpack.c.bf16 %v38_v23, %v37_v22  ;;  %v39_v25 = vld [vmem:[%s428_s1 + $0x60] sm:$0xff]  ;;  %v40_v26 = vld [vmem:[%s428_s1 + $0x68] sm:$0xff]  ;;  %v41_v28 = vld [vmem:[%s428_s1 + $0x70] sm:$0xff]  ;;  %p301_p1 = scmp.lt.s32.totalorder %s180_s0, %s180_s0 }
   0xb   :  { %v281_v27 = vpack.c.bf16 %v40_v26, %v39_v25  ;;  %v42_v29 = vld [vmem:[%s428_s1 + $0x78] sm:$0xff]  ;;  %s296_s1 = scalar_lea.vmem %s180_s0, 128 }
   0xc   :  { %v285_v30 = vpack.c.bf16 %v42_v29, %v41_v28  ;;  %p297_p0 = scmp.ne.s32.totalorder %s180_s0, %s296_s1  ;;  %p302_p2 = scmp.lt.s32.totalorder %s296_s1, %s296_s1 }
   0xd   :  { %263 = vmatpush3.bf16.xpose.msk.msra.mxu0 %vm351_vm1, %v261_v11 }
   0xe   :  { %264 = vmatprep.subr.bf16.mxu0 %v320_v5  ;;  %p303_p3 = por %p302_p2, %p301_p1 }
  0x10   :  { %p304_p4 = pnand %p303_p3, %p297_p0 }
  0x15   :  { %267 = vmatpush3.bf16.xpose.msk.msra.mxu0 %vm351_vm1, %v265_v14 }
  0x16   :  { %268 = vmatprep.subr.bf16.mxu0 %v320_v5 }
  0x1d   :  { %271 = vmatpush3.bf16.xpose.msk.msra.mxu0 %vm351_vm1, %v269_v17 }
  0x1e   :  { %272 = vmatprep.subr.bf16.mxu0 %v320_v5 }
  0x25   :  { %275 = vmatpush3.bf16.xpose.msk.msra.mxu0 %vm351_vm1, %v273_v20 }
  0x26   :  { %276 = vmatprep.subr.bf16.mxu0 %v320_v5 }
  0x2d   :  { %279 = vmatpush3.bf16.xpose.msk.msra.mxu0 %vm351_vm1, %v277_v24 }
  0x2e   :  { %280 = vmatprep.subr.bf16.mxu0 %v320_v5 }
  0x35   :  { %283 = vmatpush3.bf16.xpose.msk.msra.mxu0 %vm351_vm1, %v281_v27 }
  0x36   :  { %284 = vmatprep.subr.bf16.mxu0 %v320_v5 }
  0x3d   :  { %287 = vmatpush3.bf16.xpose.msk.msra.mxu0 %vm351_vm1, %v285_v30 }
  0x44   :  { %254 = vmatmul.mubr.msk.f32.vlgmr.msra.gmra.mrb[0].mxu0 %vm18_vm0, %v16_v0 }
  0x92   :  { %v21_v31 = vpop.xlane.xlu0 %20 }
  0x93   :  { %v22_v32 = vmax.f32 %v21_v31, 1e-16 }
  0x95   :  { %294 = vrsqrt.f32 %v22_v32 }
  0x9f   :  { %v295_v33 = vpop.eup %294 }
  0xa0   :  { %25 = vst.msk [vmem:[#allocation2] sm:$0xff] %vm24_vm3, %v295_v33 }
  0xa7   :  { %v165_v34 = vld [vmem:[#allocation2] sm:$0xff] }
  0xa8   :  { %168 = vperm.xlu0 %293, %v165_v34  }
 0x117   :  { %v161_v35 = vpop.f32.mrb[0].mxu0 }
 0x118   :  { %v255_v36 = vpop.f32.mrb[1].mxu0 }
 0x127   :  { %v169_v37 = vpop.permute.xlu0 %168 }
 0x128   :  { %v171_v38 = vmul.f32 %v169_v37, %v161_v35 }
 0x12a   :  { %172 = vst [vmem:[#allocation3] sm:$0xff] %v171_v38 }
 0x12b   :  { %307 = shalt.err (!%p304_p4)
}
 0x12c   :  { %s308_s17 = scalar_lea.hbm %s429_s2, 128 }
 0x12d   :  { %p309_p5 = scmp.ne.s32.totalorder %s429_s2, %s308_s17  ;;  %p312_p6 = scmp.lt.u32.totalorder %s308_s17, %s429_s2 }
 0x12f   :  { %p314_p7 = pnand %p312_p6, %p309_p5 }
 0x131   :  { %317 = shalt.err (!%p314_p7)
}
 0x132   :  { %182 = dma.vmem_to_hbm [thread:$0]  %s180_s0, 128, %s429_s2, [#allocation4]  }
 0x133   :  { %318 = dma.done.wait [#allocation4], 128  }
 0x134   :  { %319 = vsyncadd [#allocation4], 4294967168 }
 0x135   :  { %186 = vsyncpa [#allocation4], 1 }

</bundles_post_ra>
